<compile_context>
chip_gen: v7x
topology: tpu7x:2x2x1
jax: 0.10.0
libtpu: 0.0.40
codegen_flags: <defaults>
</compile_context>

<pallas_src>
import functools

import jax
import jax.numpy as jnp
from jax.experimental import pallas as pl
from jax.experimental.pallas import tpu as pltpu


def _round_up(x, m):
    return ((x + m - 1) // m) * m


@functools.lru_cache(maxsize=1)
def _vmem_capacity_bytes():
    """Per-core VMEM capacity; conservative fallback if the query fails."""
    try:
        return int(pltpu.get_tpu_info().vmem_capacity_bytes)
    except Exception:
        return 64 * 1024 * 1024  # v7x per-TC VMEM (smallest current chip)


@functools.lru_cache(maxsize=1)
def _single_buffering_supported():
    """Probe whether pipeline_mode=pl.Buffered(1) lowers on this backend."""
    def _k(x_ref, o_ref):
        o_ref[...] = x_ref[...] + 1.0
    try:
        spec = pl.BlockSpec((8, 128), lambda i: (0, 0),
                            pipeline_mode=pl.Buffered(1))
        f = pl.pallas_call(
            _k,
            out_shape=jax.ShapeDtypeStruct((8, 128), jnp.float32),
            grid=(1,),
            in_specs=[spec],
            out_specs=pl.BlockSpec((8, 128), lambda i: (0, 0)),
        )
        jax.block_until_ready(f(jnp.zeros((8, 128), jnp.float32)))
        return True
    except Exception:
        return False


def _mlp_kernel(x_ref, w1_ref, b1_ref, w2_ref, b2_ref, o_ref, acc_ref):
    """One (batch-tile, hidden-tile) grid step of x@W1+b1 ->ReLU-> @W2+b2."""
    k = pl.program_id(1)

    @pl.when(k == 0)
    def _():
        acc_ref[...] = jnp.zeros_like(acc_ref)

    # Cast x to the MXU compute dtype in-kernel (VPU) -> no wrapper cast pass.
    x = x_ref[...].astype(w1_ref.dtype)
    # fc1: bf16 operands, f32 accumulation on the MXU.
    h = jnp.dot(x, w1_ref[...], preferred_element_type=jnp.float32)
    # bias + ReLU in f32 (cheap on the VPU; avoids bf16 elementwise on v5e).
    h = jnp.maximum(h + b1_ref[...], 0.0)
    # dropout: eval-mode identity (PyTorch nn.Dropout is a no-op at inference).
    # TODO(synk): training-mode dropout would need pltpu.prng_seed +
    #             pltpu.prng_random_bits mask with 1/(1-p) scaling.
    # fc2 partial product over this hidden chunk, accumulated in f32.
    acc_ref[...] += jnp.dot(h.astype(w2_ref.dtype), w2_ref[...],
                            preferred_element_type=jnp.float32)

    @pl.when(k == pl.num_programs(1) - 1)
    def _():
        o_ref[...] = (acc_ref[...] + b2_ref[...]).astype(o_ref.dtype)


def _choose_hidden_tile(In_p, H_p, O_p, tb, w_item, x_item, out_item, budget):
    """Largest multiple-of-128 divisor of H_p whose footprint fits the budget."""
    candidates = [d for d in range(H_p, 127, -128) if H_p % d == 0]
    for th in candidates:
        n_h = H_p // th
        nbuf_w = 1 if n_h == 1 else 2
        weights = nbuf_w * ((In_p * th + th * O_p) * w_item + th * 4) + O_p * 4
        tiles = 2 * tb * In_p * x_item + 2 * tb * O_p * out_item + tb * O_p * 4
        inter = tb * In_p * w_item + tb * th * (4 + w_item)
        if weights + tiles + inter <= budget:
            return th
    return 128


def prepare_params(w1, b1, w2, b2, compute_dtype=jnp.bfloat16):
    """Pad feature dims to lane-dense multiples of 128 and cast weights to the
    MXU compute dtype ONCE (hoisted out of the per-forward-call path).

    w1: [In, H], b1: [H] or [1, H], w2: [H, O], b2: [O] or [1, O].
    Zero padding contributes exactly 0 to both contractions.
    """
    In, H = w1.shape
    _, O = w2.shape
    In_p, H_p, O_p = (_round_up(d, 128) for d in (In, H, O))
    w1_p = jnp.zeros((In_p, H_p), compute_dtype).at[:In, :H].set(
        w1.astype(compute_dtype))
    w2_p = jnp.zeros((H_p, O_p), compute_dtype).at[:H, :O].set(
        w2.astype(compute_dtype))
    b1_p = jnp.zeros((1, H_p), jnp.float32).at[:, :H].set(
        b1.astype(jnp.float32).reshape(1, H))
    b2_p = jnp.zeros((1, O_p), jnp.float32).at[:, :O].set(
        b2.astype(jnp.float32).reshape(1, O))
    return {"w1": w1_p, "b1": b1_p, "w2": w2_p, "b2": b2_p, "dims": (In, H, O)}


@functools.partial(jax.jit,
                   static_argnames=("out_features", "block_b", "use_buffered"))
def _forward_impl(x, w1_p, b1_p, w2_p, b2_p, *,
                  out_features, block_b, use_buffered):
    B, In = x.shape
    In_p, H_p = w1_p.shape
    _, O_p = w2_p.shape
    out_dtype = x.dtype
    w_item = jnp.dtype(w1_p.dtype).itemsize
    x_item = jnp.dtype(x.dtype).itemsize
    out_item = jnp.dtype(out_dtype).itemsize

    capacity = _vmem_capacity_bytes()
    if block_b is None:
        # Bigger batch tiles on 128 MiB chips (v5e/v6e); conservative on v7x.
        block_b = 1024 if capacity >= 96 * 1024 * 1024 else 512

    # Batch tile: multiple of 16 (bf16 sublane packing); when B is small, split
    # into >=2 grid steps so v7x's two TensorCores both get work.
    if B >= 2 * block_b:
        tb = block_b
    else:
        tb = min(block_b, max(16, _round_up(pl.cdiv(B, 2), 16)))
    B_p = _round_up(B, tb)
    n_b = B_p // tb

    # Hidden-dim tiling so resident weights + intermediates fit the VMEM budget.
    budget = int(0.75 * capacity)
    th = _choose_hidden_tile(In_p, H_p, O_p, tb, w_item, x_item, out_item, budget)
    n_h = H_p // th
    w_invariant = (n_h == 1)

    # Pad x only when actually needed (no copy when shapes already align).
    if B_p != B or In_p != In:
        x_in = jnp.zeros((B_p, In_p), x.dtype).at[:B, :In].set(x)
    else:
        x_in = x

    # VMEM accounting: single-buffered grid-invariant weights when supported.
    nbuf_w = 1 if (w_invariant and use_buffered) else 2
    vmem_bytes = (
        nbuf_w * ((In_p * th + th * O_p) * w_item + th * 4) + O_p * 4
        + 2 * tb * In_p * x_item          # input tiles (double-buffered)
        + 2 * tb * O_p * out_item         # output tiles (double-buffered)
        + tb * O_p * 4                    # f32 accumulator scratch
        + tb * In_p * w_item + tb * th * (4 + w_item)  # in-kernel temporaries
    )
    vmem_limit = int(min(capacity, max(int(1.5 * vmem_bytes), 32 * 1024 * 1024)))

    def _spec(shape, index_map, invariant=False):
        if use_buffered and invariant:
            return pl.BlockSpec(shape, index_map, pipeline_mode=pl.Buffered(1))
        return pl.BlockSpec(shape, index_map)

    in_specs = [
        pl.BlockSpec((tb, In_p), lambda i, k: (i, 0)),
        _spec((In_p, th), lambda i, k: (0, k), invariant=w_invariant),
        _spec((1, th), lambda i, k: (0, k), invariant=w_invariant),
        _spec((th, O_p), lambda i, k: (k, 0), invariant=w_invariant),
        _spec((1, O_p), lambda i, k: (0, 0), invariant=True),
    ]

    flops = 2 * B_p * (In_p * H_p + H_p * O_p)
    bytes_accessed = (B_p * In_p * x_item
                      + (In_p * H_p + H_p * O_p) * w_item
                      + (H_p + O_p) * 4
                      + B_p * O_p * out_item)

    out_p = pl.pallas_call(
        _mlp_kernel,
        out_shape=jax.ShapeDtypeStruct((B_p, O_p), out_dtype),
        grid=(n_b, n_h),
        in_specs=in_specs,
        out_specs=pl.BlockSpec((tb, O_p), lambda i, k: (i, 0)),
        scratch_shapes=[pltpu.VMEM((tb, O_p), jnp.float32)],
        compiler_params=pltpu.CompilerParams(
            dimension_semantics=("parallel", "arbitrary"),
            vmem_limit_bytes=vmem_limit,
        ),
        cost_estimate=pl.CostEstimate(
            flops=flops, transcendentals=0, bytes_accessed=bytes_accessed),
    )(x_in, w1_p, b1_p, w2_p, b2_p)

    if B_p != B or O_p != out_features:
        out_p = out_p[:B, :out_features]
    return out_p


def simple_nn_forward(x, params, *, block_b=None):
    """x: [B, In]; params from prepare_params(...). Returns [B, O] in x.dtype."""
    _, _, out_features = params["dims"]
    return _forward_impl(
        x, params["w1"], params["b1"], params["w2"], params["b2"],
        out_features=out_features, block_b=block_b,
        use_buffered=_single_buffering_supported())


def init_params(key, input_size, hidden_size, output_size, dtype=jnp.float32):
    """Deterministic init mimicking nn.Linear defaults (uniform(+-1/sqrt(fan_in)))."""
    k1, k2, k3, k4 = jax.random.split(key, 4)
    bound1 = 1.0 / (input_size ** 0.5)
    bound2 = 1.0 / (hidden_size ** 0.5)
    # Stored as [in, out] (transpose of PyTorch's [out, in]) for direct matmul.
    w1 = jax.random.uniform(k1, (input_size, hidden_size), dtype, -bound1, bound1)
    b1 = jax.random.uniform(k2, (1, hidden_size), dtype, -bound1, bound1)
    w2 = jax.random.uniform(k3, (hidden_size, output_size), dtype, -bound2, bound2)
    b2 = jax.random.uniform(k4, (1, output_size), dtype, -bound2, bound2)
    return w1, b1, w2, b2


if __name__ == "__main__":
    batch = 8
    input_size = 16
    hidden_size = 32
    output_size = 8

    key = jax.random.PRNGKey(0)
    kx, kp = jax.random.split(key)
    x = jax.random.normal(kx, (batch, input_size), jnp.float32)
    w1, b1, w2, b2 = init_params(kp, input_size, hidden_size, output_size)

    # Weight pad + bf16 cast done ONCE, outside the per-call path.
    params = prepare_params(w1, b1, w2, b2)

    out = simple_nn_forward(x, params)
    out = jax.block_until_ready(out)

    # quick correctness check against plain f32 JAX reference
    # (bf16 matmul operands with f32 accumulation -> loose tolerance)
    ref = jnp.maximum(x @ w1 + b1, 0.0) @ w2 + b2
    assert out.shape == (batch, output_size)
    assert jnp.allclose(out, ref, atol=5e-2, rtol=5e-2), (
        float(jnp.max(jnp.abs(out - ref))))

    print("KERNEL_OK")
</pallas_src>

<mosaic_0001>
module attributes {stable_mosaic.version = 11 : i64} {
  func.func @_k(%arg0: i32, %arg1: memref<8x128xf32, #tpu.memory_space<vmem>>, %arg2: memref<8x128xf32, #tpu.memory_space<vmem>>) attributes {dimension_semantics = [#tpu.dimension_semantics<arbitrary>], iteration_bounds = array<i64: 1>, scalar_prefetch = 0 : i64, scratch_operands = 0 : i64, tpu.core_type = #tpu.core_type<tc>, window_params = [{pipeline_mode = #tpu.pipeline_mode<synchronous>, transform_indices = @transform_0, window_bounds = array<i64: 8, 128>}, {pipeline_mode = #tpu.pipeline_mode<synchronous>, transform_indices = @transform_1, window_bounds = array<i64: 8, 128>}]} {
    %c0 = arith.constant 0 : index
    %c0_0 = arith.constant 0 : index
    %0 = vector.load %arg1[%c0, %c0_0] : memref<8x128xf32, #tpu.memory_space<vmem>>, vector<8x128xf32>
    %cst = arith.constant 1.000000e+00 : f32
    %1 = vector.broadcast %cst : f32 to vector<8x128xf32>
    %2 = arith.addf %0, %1 : vector<8x128xf32>
    %c0_1 = arith.constant 0 : index
    %c0_2 = arith.constant 0 : index
    %3 = vector.load %arg2[%c0_1, %c0_2] : memref<8x128xf32, #tpu.memory_space<vmem>>, vector<8x128xf32>
    tpu.vector_store %arg2[%c0_1, %c0_2], %2 {strides = array<i32>} : memref<8x128xf32, #tpu.memory_space<vmem>>, vector<8x128xf32>,
    return
  }
  func.func @transform_0(%arg0: i32) -> (i32, i32) {
    %c0_i32 = arith.constant 0 : i32
    %c0_i32_0 = arith.constant 0 : i32
    %c0_i32_1 = arith.constant 0 : i32
    return %c0_i32, %c0_i32_0 : i32, i32
  }
  func.func @transform_1(%arg0: i32) -> (i32, i32) {
    %c0_i32 = arith.constant 0 : i32
    %c0_i32_0 = arith.constant 0 : i32
    %c0_i32_1 = arith.constant 0 : i32
    return %c0_i32, %c0_i32_0 : i32, i32
  }
}

module attributes {stable_mosaic.version = 11 : i64} {
  func.func @_mlp_kernel(%arg0: i32, %arg1: i32, %arg2: memref<16x128xf32, #tpu.memory_space<vmem>>, %arg3: memref<128x128xbf16, #tpu.memory_space<vmem>>, %arg4: memref<1x128xf32, #tpu.memory_space<vmem>>, %arg5: memref<128x128xbf16, #tpu.memory_space<vmem>>, %arg6: memref<1x128xf32, #tpu.memory_space<vmem>>, %arg7: memref<16x128xf32, #tpu.memory_space<vmem>>, %arg8: memref<16x128xf32, #tpu.memory_space<vmem>>) attributes {dimension_semantics = [#tpu.dimension_semantics<parallel>, #tpu.dimension_semantics<arbitrary>], iteration_bounds = array<i64: 1, 1>, scalar_prefetch = 0 : i64, scratch_operands = 1 : i64, tpu.core_type = #tpu.core_type<tc>, window_params = [{transform_indices = @transform_0, window_bounds = array<i64: 16, 128>}, {transform_indices = @transform_1, window_bounds = array<i64: 128, 128>}, {transform_indices = @transform_2, window_bounds = array<i64: 1, 128>}, {transform_indices = @transform_3, window_bounds = array<i64: 128, 128>}, {pipeline_mode = #tpu.pipeline_mode<synchronous>, transform_indices = @transform_4, window_bounds = array<i64: 1, 128>}, {transform_indices = @transform_5, window_bounds = array<i64: 16, 128>}]} {
    %c0_i32 = arith.constant 0 : i32
    %0 = arith.cmpi eq, %arg1, %c0_i32 : i32
    %1 = arith.extui %0 : i1 to i32
    %c0_i32_0 = arith.constant 0 : i32
    %2 = arith.cmpi ne, %1, %c0_i32_0 : i32
    scf.if %2 {
      %cst_16 = arith.constant 0.000000e+00 : f32
      %21 = vector.broadcast %cst_16 : f32 to vector<16x128xf32>
      %c0_17 = arith.constant 0 : index
      %c0_18 = arith.constant 0 : index
      %22 = vector.load %arg8[%c0_17, %c0_18] : memref<16x128xf32, #tpu.memory_space<vmem>>, vector<16x128xf32>
      tpu.vector_store %arg8[%c0_17, %c0_18], %21 {strides = array<i32>} : memref<16x128xf32, #tpu.memory_space<vmem>>, vector<16x128xf32>,
    } else {
    }
    %c0 = arith.constant 0 : index
    %c0_1 = arith.constant 0 : index
    %3 = vector.load %arg2[%c0, %c0_1] : memref<16x128xf32, #tpu.memory_space<vmem>>, vector<16x128xf32>
    %4 = arith.truncf %3 : vector<16x128xf32> to vector<16x128xbf16>
    %c0_2 = arith.constant 0 : index
    %c0_3 = arith.constant 0 : index
    %5 = vector.load %arg3[%c0_2, %c0_3] : memref<128x128xbf16, #tpu.memory_space<vmem>>, vector<128x128xbf16>
    %cst = arith.constant dense<0.000000e+00> : vector<16x128xf32>
    %6 = tpu.matmul %4, %5, %cst {dimension_numbers = #tpu.dot_dimension_numbers<[1], [0], [0], [1], [0, 0, 1, 1], [], []>} : vector<16x128xbf16>, vector<128x128xbf16>, vector<16x128xf32> -> vector<16x128xf32>
    %c0_4 = arith.constant 0 : index
    %c0_5 = arith.constant 0 : index
    %7 = vector.load %arg4[%c0_4, %c0_5] : memref<1x128xf32, #tpu.memory_space<vmem>>, vector<1x128xf32>
    %8 = vector.broadcast %7 : vector<1x128xf32> to vector<16x128xf32>
    %9 = arith.addf %6, %8 : vector<16x128xf32>
    %cst_6 = arith.constant 0.000000e+00 : f32
    %10 = vector.broadcast %cst_6 : f32 to vector<16x128xf32>
    %11 = arith.maximumf %9, %10 : vector<16x128xf32>
    %c0_7 = arith.constant 0 : index
    %c0_8 = arith.constant 0 : index
    %12 = vector.load %arg8[%c0_7, %c0_8] : memref<16x128xf32, #tpu.memory_space<vmem>>, vector<16x128xf32>
    %13 = arith.truncf %11 : vector<16x128xf32> to vector<16x128xbf16>
    %c0_9 = arith.constant 0 : index
    %c0_10 = arith.constant 0 : index
    %14 = vector.load %arg5[%c0_9, %c0_10] : memref<128x128xbf16, #tpu.memory_space<vmem>>, vector<128x128xbf16>
    %cst_11 = arith.constant dense<0.000000e+00> : vector<16x128xf32>
    %15 = tpu.matmul %13, %14, %cst_11 {dimension_numbers = #tpu.dot_dimension_numbers<[1], [0], [0], [1], [0, 0, 1, 1], [], []>} : vector<16x128xbf16>, vector<128x128xbf16>, vector<16x128xf32> -> vector<16x128xf32>
    %16 = arith.addf %12, %15 : vector<16x128xf32>
    %c0_12 = arith.constant 0 : index
    %c0_13 = arith.constant 0 : index
    %17 = vector.load %arg8[%c0_12, %c0_13] : memref<16x128xf32, #tpu.memory_space<vmem>>, vector<16x128xf32>
    tpu.vector_store %arg8[%c0_12, %c0_13], %16 {strides = array<i32>} : memref<16x128xf32, #tpu.memory_space<vmem>>, vector<16x128xf32>,
    %c0_i32_14 = arith.constant 0 : i32
    %18 = arith.cmpi eq, %arg1, %c0_i32_14 : i32
    %19 = arith.extui %18 : i1 to i32
    %c0_i32_15 = arith.constant 0 : i32
    %20 = arith.cmpi ne, %19, %c0_i32_15 : i32
    scf.if %20 {
      %c0_16 = arith.constant 0 : index
      %c0_17 = arith.constant 0 : index
      %21 = vector.load %arg8[%c0_16, %c0_17] : memref<16x128xf32, #tpu.memory_space<vmem>>, vector<16x128xf32>
      %c0_18 = arith.constant 0 : index
      %c0_19 = arith.constant 0 : index
      %22 = vector.load %arg6[%c0_18, %c0_19] : memref<1x128xf32, #tpu.memory_space<vmem>>, vector<1x128xf32>
      %23 = vector.broadcast %22 : vector<1x128xf32> to vector<16x128xf32>
      %24 = arith.addf %21, %23 : vector<16x128xf32>
      %c0_20 = arith.constant 0 : index
      %c0_21 = arith.constant 0 : index
      %25 = vector.load %arg7[%c0_20, %c0_21] : memref<16x128xf32, #tpu.memory_space<vmem>>, vector<16x128xf32>
      tpu.vector_store %arg7[%c0_20, %c0_21], %24 {strides = array<i32>} : memref<16x128xf32, #tpu.memory_space<vmem>>, vector<16x128xf32>,
    } else {
    }
    return
  }
  func.func @transform_0(%arg0: i32, %arg1: i32) -> (i32, i32) {
    %c0_i32 = arith.constant 0 : i32
    %c0_i32_0 = arith.constant 0 : i32
    return %arg0, %c0_i32 : i32, i32
  }
  func.func @transform_1(%arg0: i32, %arg1: i32) -> (i32, i32) {
    %c0_i32 = arith.constant 0 : i32
    %c0_i32_0 = arith.constant 0 : i32
    return %c0_i32, %arg1 : i32, i32
  }
  func.func @transform_2(%arg0: i32, %arg1: i32) -> (i32, i32) {
    %c0_i32 = arith.constant 0 : i32
    %c0_i32_0 = arith.constant 0 : i32
    return %c0_i32, %arg1 : i32, i32
  }
  func.func @transform_3(%arg0: i32, %arg1: i32) -> (i32, i32) {
    %c0_i32 = arith.constant 0 : i32
    %c0_i32_0 = arith.constant 0 : i32
    return %arg1, %c0_i32 : i32, i32
  }
  func.func @transform_4(%arg0: i32, %arg1: i32) -> (i32, i32) {
    %c0_i32 = arith.constant 0 : i32
    %c0_i32_0 = arith.constant 0 : i32
    %c0_i32_1 = arith.constant 0 : i32
    return %c0_i32, %c0_i32_0 : i32, i32
  }
  func.func @transform_5(%arg0: i32, %arg1: i32) -> (i32, i32) {
    %c0_i32 = arith.constant 0 : i32
    %c0_i32_0 = arith.constant 0 : i32
    return %arg0, %c0_i32 : i32, i32
  }
}

</mosaic_0001>

<bundles_post_ra>
// kernel: tpu_custom_call.1
= control target key start
LH: loop header
LB: loop body
LE: loop exit
PB: predicated region body
PF: predicated region fallthrough
CT: control target
= control target key end

     0   :  { %6 = vsyncpa [#allocation3], 0  ;;  %s125_s0 = inlined_call_operand.hbm [shape: f32[8,128], index: 0, kind: input, shape index: {}]   ;;  %s126_s1 = inlined_call_operand.hbm [shape: f32[8,128], index: 1, kind: output, shape index: {}]  }
   0x1   :  { %7 = vsyncpa [#allocation4], 0  ;;  %s89_s6 = smov [#allocation2]   ;;  %s41_s10 = scalar_lea.hbm %s125_s0, 128 }
   0x2   :  { %s14_s7 = sshll.u32 %s89_s6, 4  ;;  %p42_p0 = scmp.ne.s32.totalorder %s125_s0, %s41_s10  ;;  %s15_s7 = int_to_ptr.vmem [resolvable:$true] %s14_s7 }
   0x3   :  { %p45_p1 = scmp.lt.u32.totalorder %s41_s10, %s125_s0 }
   0x5   :  { %p47_p2 = pnand %p45_p1, %p42_p0 }
   0x7   :  { %50 = shalt.err (!%p47_p2)
}
   0x8   :  { %s51_s15 = scalar_lea.vmem %s15_s7, 128  ;;  %p56_p4 = scmp.lt.s32.totalorder %s15_s7, %s15_s7 }
   0x9   :  { %p52_p3 = scmp.ne.s32.totalorder %s15_s7, %s51_s15  ;;  %p57_p5 = scmp.lt.s32.totalorder %s51_s15, %s51_s15 }
   0xb   :  { %p58_p6 = por %p57_p5, %p56_p4 }
   0xd   :  { %p59_p7 = pnand %p58_p6, %p52_p3 }
   0xf   :  { %62 = shalt.err (!%p59_p7)
}
  0x10   :  { %17 = dma.hbm_to_vmem [thread:$0]  %s125_s0, 128, %s15_s7, [#allocation3]  }
  0x11   :  { %85 = dma.done.wait [#allocation3], 128  }
  0x12   :  { %86 = vsyncadd [#allocation3], 4294967168  ;;  %s90_s18 = smov [#allocation5]   ;;  %v21_v0 = vld [vmem:[#allocation2] sm:$0xff] }
  0x13   :  { %s30_s19 = sshll.u32 %s90_s18, 4  ;;  %v22_v1 = vadd.f32 1.0, %v21_v0  ;;  %s31_s19 = int_to_ptr.vmem [resolvable:$true] %s30_s19 }
  0x14   :  { %s63_s20 = scalar_lea.vmem %s31_s19, 128  ;;  %p68_p9 = scmp.lt.s32.totalorder %s31_s19, %s31_s19 }
  0x15   :  { %23 = vst [vmem:[#allocation5] sm:$0xff] %v22_v1  ;;  %p64_p8 = scmp.ne.s32.totalorder %s31_s19, %s63_s20  ;;  %p69_p10 = scmp.lt.s32.totalorder %s63_s20, %s63_s20 }
  0x17   :  { %p70_p11 = por %p69_p10, %p68_p9 }
  0x19   :  { %p71_p12 = pnand %p70_p11, %p64_p8 }
  0x1b   :  { %74 = shalt.err (!%p71_p12)
}
  0x1c   :  { %s75_s23 = scalar_lea.hbm %s126_s1, 128 }
  0x1d   :  { %p76_p13 = scmp.ne.s32.totalorder %s126_s1, %s75_s23  ;;  %p79_p0 = scmp.lt.u32.totalorder %s75_s23, %s126_s1 }
  0x1f   :  { %p81_p1 = pnand %p79_p0, %p76_p13 }
  0x21   :  { %84 = shalt.err (!%p81_p1)
}
  0x22   :  { %33 = dma.vmem_to_hbm [thread:$0]  %s31_s19, 128, %s126_s1, [#allocation4]  }
  0x23   :  { %87 = dma.done.wait [#allocation4], 128  }
  0x24   :  { %88 = vsyncadd [#allocation4], 4294967168 }
  0x25   :  { %37 = vsyncpa [#allocation3], 1 }
  0x26   :  { %38 = vsyncpa [#allocation4], 1 }

// kernel: _forward_impl.1
= control target key start
LH: loop header
LB: loop body
LE: loop exit
PB: predicated region body
PF: predicated region fallthrough
CT: control target
= control target key end

     0   :  { %10 = vsyncpa [#allocation4], 0  ;;  %s530_s0 = inlined_call_operand.vmem [shape: f32[16,128], index: 0, kind: input, shape index: {}]   ;;  %s531_s1 = inlined_call_operand.hbm [shape: bf16[128,128], index: 1, kind: input, shape index: {}]   ;;  %s532_s2 = inlined_call_operand.vmem [shape: f32[1,128], index: 2, kind: input, shape index: {}]   ;;  %s533_s3 = inlined_call_operand.hbm [shape: bf16[128,128], index: 3, kind: input, shape index: {}]   ;;  %s534_s4 = inlined_call_operand.vmem [shape: f32[1,128], index: 4, kind: input, shape index: {}]   ;;  %s535_s5 = inlined_call_operand.vmem [shape: f32[16,128], index: 5, kind: output, shape index: {}]  }
   0x1   :  { %11 = vsyncpa [#allocation6], 0  ;;  %s452_s18 = smov [#allocation3]   ;;  %s404_s22 = scalar_lea.hbm %s531_s1, 1024 }
   0x2   :  { %s19_s19 = sshll.u32 %s452_s18, 4  ;;  %p405_p0 = scmp.ne.s32.totalorder %s531_s1, %s404_s22  ;;  %s20_s19 = int_to_ptr.vmem [resolvable:$true] %s19_s19 }
   0x3   :  { %p408_p1 = scmp.lt.u32.totalorder %s404_s22, %s531_s1 }
   0x5   :  { %p410_p2 = pnand %p408_p1, %p405_p0 }
   0x7   :  { %413 = shalt.err (!%p410_p2)
}
   0x8   :  { %s414_s27 = scalar_lea.vmem %s20_s19, 1024  ;;  %p419_p4 = scmp.lt.s32.totalorder %s20_s19, %s20_s19 }
   0x9   :  { %p415_p3 = scmp.ne.s32.totalorder %s20_s19, %s414_s27  ;;  %p420_p5 = scmp.lt.s32.totalorder %s414_s27, %s414_s27 }
   0xb   :  { %p421_p6 = por %p420_p5, %p419_p4 }
   0xd   :  { %p422_p7 = pnand %p421_p6, %p415_p3 }
   0xf   :  { %425 = shalt.err (!%p422_p7)
}
  0x10   :  { %s453_s28 = smov 64   ;;  %s454_s29 = smov 4  }
  0x11   :  { %25 = dma.hbm_to_vmem [thread:$0]  %s531_s1, 1024, %s20_s19, [#allocation4], %s453_s28, %s453_s28, %s454_s29  }
  0x12   :  { %s455_s7 = smov [#allocation5]   ;;  %s426_s11 = scalar_lea.hbm %s533_s3, 1024 }
  0x13   :  { %s33_s8 = sshll.u32 %s455_s7, 4  ;;  %p427_p8 = scmp.ne.s32.totalorder %s533_s3, %s426_s11  ;;  %s34_s8 = int_to_ptr.vmem [resolvable:$true] %s33_s8 }
  0x14   :  { %p430_p9 = scmp.lt.u32.totalorder %s426_s11, %s533_s3 }
  0x16   :  { %p432_p10 = pnand %p430_p9, %p427_p8 }
  0x18   :  { %435 = shalt.err (!%p432_p10)
}
  0x19   :  { %s436_s16 = scalar_lea.vmem %s34_s8, 1024  ;;  %p441_p12 = scmp.lt.s32.totalorder %s34_s8, %s34_s8 }
  0x1a   :  { %p437_p11 = scmp.ne.s32.totalorder %s34_s8, %s436_s16  ;;  %p442_p13 = scmp.lt.s32.totalorder %s436_s16, %s436_s16 }
  0x1c   :  { %p443_p0 = por %p442_p13, %p441_p12 }
  0x1e   :  { %p444_p1 = pnand %p443_p0, %p437_p11 }
  0x20   :  { %447 = shalt.err (!%p444_p1)
}
  0x21   :  { %39 = dma.hbm_to_vmem [thread:$0]  %s533_s3, 1024, %s34_s8, [#allocation6], %s453_s28, %s453_s28, %s454_s29  }
  0x22   :  { %448 = dma.done.wait [#allocation4], 1024  }
  0x23   :  { %449 = vsyncadd [#allocation4], 4294966272 }
  0x24   :  { %450 = dma.done.wait [#allocation6], 1024  }
  0x25   :  { %451 = vsyncadd [#allocation6], 4294966272  ;;  %v456_v0 = vmov 0.0   ;;  %vm457_vm0 = vmmov 0   ;;  %v388_v1 = vld [vmem:[#allocation3] sm:$0xff]   ;;  %v389_v2 = vld [vmem:[#allocation3 + $0x8] sm:$0xff]  }
  0x26   :  { %342 = vmatprep.subr.bf16.mxu0 %v456_v0  ;;  %358 = vmatprep.mubr.msk.bf16.mxu0 %vm457_vm0, %v456_v0  ;;  %v390_v3 = vld [vmem:[#allocation3 + $0x10] sm:$0xff]   ;;  %v396_v4 = vld [vmem:[#allocation5] sm:$0xff]   ;;  %v391_v5 = vld [vmem:[#allocation3 + $0x18] sm:$0xff]  }
  0x27   :  { %362 = vmatprep.subr.bf16.mxu1 %v456_v0  ;;  %378 = vmatprep.mubr.msk.bf16.mxu1 %vm457_vm0, %v456_v0  ;;  %v397_v6 = vld [vmem:[#allocation5 + $0x8] sm:$0xff]   ;;  %v392_v7 = vld [vmem:[#allocation3 + $0x20] sm:$0xff]   ;;  %v398_v8 = vld [vmem:[#allocation5 + $0x10] sm:$0xff]  }
  0x28   :  { %343 = vmatpush3.bf16.msra.mxu0 %v388_v1  ;;  %363 = vmatpush3.bf16.msra.mxu1 %v396_v4  ;;  %v393_v9 = vld [vmem:[#allocation3 + $0x28] sm:$0xff]   ;;  %v399_v10 = vld [vmem:[#allocation5 + $0x18] sm:$0xff]   ;;  %v394_v11 = vld [vmem:[#allocation3 + $0x30] sm:$0xff]  }
  0x29   :  { %344 = vmatprep.subr.bf16.mxu0 %v456_v0  ;;  %364 = vmatprep.subr.bf16.mxu1 %v456_v0  ;;  %v400_v12 = vld [vmem:[#allocation5 + $0x20] sm:$0xff]   ;;  %v395_v13 = vld [vmem:[#allocation3 + $0x38] sm:$0xff]   ;;  %v56_v15 = vld [vmem:[%s530_s0 + $0x8] sm:$0xff] }
  0x2a   :  { %v55_v14 = vld [vmem:[%s530_s0] sm:$0xff]  ;;  %v401_v16 = vld [vmem:[#allocation5 + $0x28] sm:$0xff]   ;;  %v402_v18 = vld [vmem:[#allocation5 + $0x30] sm:$0xff]  }
  0x2b   :  { %v57_v17 = vpack.c.bf16 %v56_v15, %v55_v14  ;;  %v403_v19 = vld [vmem:[#allocation5 + $0x38] sm:$0xff]   ;;  %v306_v20 = vld [vmem:[%s532_s2] ss:$0 sm:$0xff] }
  0x2c   :  { %345 = vmatpush3.bf16.msra.mxu0 %v389_v2  ;;  %365 = vmatpush3.bf16.msra.mxu1 %v397_v6  ;;  %v323_v30 = vld [vmem:[%s534_s4] ss:$0 sm:$0xff] }
  0x2d   :  { %346 = vmatprep.subr.bf16.mxu0 %v456_v0  ;;  %366 = vmatprep.subr.bf16.mxu1 %v456_v0 }
  0x30   :  { %347 = vmatpush3.bf16.msra.mxu0 %v390_v3  ;;  %367 = vmatpush3.bf16.msra.mxu1 %v398_v8 }
  0x31   :  { %348 = vmatprep.subr.bf16.mxu0 %v456_v0  ;;  %368 = vmatprep.subr.bf16.mxu1 %v456_v0 }
  0x34   :  { %349 = vmatpush3.bf16.msra.mxu0 %v391_v5  ;;  %369 = vmatpush3.bf16.msra.mxu1 %v399_v10 }
  0x35   :  { %350 = vmatprep.subr.bf16.mxu0 %v456_v0  ;;  %370 = vmatprep.subr.bf16.mxu1 %v456_v0 }
  0x38   :  { %351 = vmatpush3.bf16.msra.mxu0 %v392_v7  ;;  %371 = vmatpush3.bf16.msra.mxu1 %v400_v12 }
  0x39   :  { %352 = vmatprep.subr.bf16.mxu0 %v456_v0  ;;  %372 = vmatprep.subr.bf16.mxu1 %v456_v0 }
  0x3c   :  { %353 = vmatpush3.bf16.msra.mxu0 %v393_v9  ;;  %373 = vmatpush3.bf16.msra.mxu1 %v401_v16 }
  0x3d   :  { %354 = vmatprep.subr.bf16.mxu0 %v456_v0  ;;  %374 = vmatprep.subr.bf16.mxu1 %v456_v0 }
  0x40   :  { %355 = vmatpush3.bf16.msra.mxu0 %v394_v11  ;;  %375 = vmatpush3.bf16.msra.mxu1 %v402_v18 }
  0x41   :  { %356 = vmatprep.subr.bf16.mxu0 %v456_v0  ;;  %376 = vmatprep.subr.bf16.mxu1 %v456_v0 }
  0x44   :  { %357 = vmatpush3.bf16.msra.mxu0 %v395_v13  ;;  %377 = vmatpush3.bf16.msra.mxu1 %v403_v19 }
  0x47   :  { %359 = vmatmul.mubr.bf16.vlgmr.msra.gmra.mrb[0].mxu0 %v57_v17 }
 0x11a   :  { %v163_v21 = vpop.f32.mrb[0].mxu0 }
 0x11b   :  { %v164_v22 = vadd.f32 %v306_v20, %v163_v21  ;;  %v360_v23 = vpop.f32.mrb[1].mxu0 }
 0x11c   :  { %v166_v24 = vpop.f32.mrb[2].mxu0 }
 0x11d   :  { %v167_v25 = vadd.f32 %v306_v20, %v166_v24  ;;  %v361_v26 = vpop.f32.mrb[3].mxu0  ;;  %v170_v27 = vmax.f32 %v164_v22, 0.0 }
 0x11f   :  { %v171_v28 = vmax.f32 %v167_v25, 0.0 }
 0x121   :  { %v174_v29 = vpack.c.bf16 %v171_v28, %v170_v27 }
 0x123   :  { %379 = vmatmul.mubr.bf16.vlgmr.msra.gmra.mrb[0].mxu1 %v174_v29 }
 0x1f6   :  { %v273_v31 = vpop.f32.mrb[0].mxu1 }
 0x1f7   :  { %v296_v32 = vadd.f32 %v323_v30, %v273_v31  ;;  %v380_v33 = vpop.f32.mrb[1].mxu1 }
 0x1f8   :  { %v276_v34 = vpop.f32.mrb[2].mxu1 }
 0x1f9   :  { %298 = vst [vmem:[%s535_s5] sm:$0xff] %v296_v32  ;;  %v297_v35 = vadd.f32 %v323_v30, %v276_v34  ;;  %v381_v36 = vpop.f32.mrb[3].mxu1 }
 0x1fb   :  { %299 = vst [vmem:[%s535_s5 + $0x8] sm:$0xff] %v297_v35 }
 0x1fc   :  { %304 = vsyncpa [#allocation4], 1 }
 0x1fd   :  { %305 = vsyncpa [#allocation6], 1 }

</bundles_post_ra>
